<compile_context>
chip_gen: v7x
topology: tpu7x:2x2x1
jax: 0.10.0
libtpu: 0.0.40
codegen_flags: <defaults>
</compile_context>

<pallas_src>
import functools

import jax
import jax.numpy as jnp
from jax import lax
from jax.experimental import pallas as pl
from jax.experimental.pallas import tpu as pltpu

BN_EPS = 1e-5

# If the fused (whole-N-resident) path would need more VMEM than this, switch
# to the N-blocked two-pass path.
_FUSED_VMEM_BUDGET = 32 * 1024 * 1024


# ----------------------------------------------------------------------------
# small static helpers (tile selection, VMEM limit)
# ----------------------------------------------------------------------------
def _largest_dividing_multiple(extent, target, step):
    """Largest multiple of `step` that divides `extent` and is <= target."""
    t = min(target, extent)
    t -= t % step
    while t >= step:
        if extent % t == 0:
            return t
        t -= step
    return None


def _pick_tile(extent, target):
    if extent <= target:
        return extent
    return _largest_dividing_multiple(extent, target, 128) or extent


def _pick_row_chunk(n, target=512):
    if n <= target:
        return n
    return _largest_dividing_multiple(n, target, 8) or n


def _vmem_limit(need_bytes):
    # >= default scoped limit everywhere, capped at v7x physical VMEM.
    return int(min(64 * 1024 * 1024, max(32 * 1024 * 1024, need_bytes + (2 << 20))))


# ----------------------------------------------------------------------------
# fused path: whole batch resident, output block is the accumulator
# ----------------------------------------------------------------------------
def _fused_enc_kernel(x_ref, w_ref, gamma_ref, beta_ref, o_ref, *, row_chunk):
    """grid = (H_tiles, K_tiles); K (contraction) is the last, arbitrary axis.

    o_ref's block index is (0, j) for every k, so the output block is the
    VMEM-resident f32 accumulator across the whole K reduction (no scratch).
    """
    k = pl.program_id(1)

    @pl.when(k == 0)
    def _init():
        o_ref[...] = jnp.zeros_like(o_ref)

    # MXU hot path (bf16 or f32 operands, f32 accumulation).
    o_ref[...] += jnp.dot(x_ref[...], w_ref[...], preferred_element_type=jnp.float32)

    @pl.when(k == pl.num_programs(1) - 1)
    def _finalize():
        y = o_ref[...]                                 # (N, tile_h) f32
        # BatchNorm1d batch statistics (biased variance), as torch in training.
        mean = jnp.mean(y, axis=0, keepdims=True)      # (1, tile_h)
        d = y - mean
        var = jnp.mean(d * d, axis=0, keepdims=True)
        scale = gamma_ref[...] * lax.rsqrt(var + BN_EPS)
        shift = beta_ref[...] - mean * scale

        n_rows = o_ref.shape[0]
        n_chunks = n_rows // row_chunk

        # Normalize + affine + tanh + store in row chunks (bounded live ranges).
        def body(c, carry):
            r = pl.multiple_of(c * row_chunk, row_chunk)
            blk = o_ref[pl.ds(r, row_chunk), :]
            o_ref[pl.ds(r, row_chunk), :] = jnp.tanh(blk * scale + shift)
            return carry

        lax.fori_loop(0, n_chunks, body, 0, unroll=n_chunks <= 8)


def _fused_call(x_mm, w_mm, gamma2d, beta2d, n, in_feat, hidden, tile_h, tile_k):
    x_b = x_mm.dtype.itemsize
    h_tiles = hidden // tile_h
    k_tiles = in_feat // tile_k
    row_chunk = _pick_row_chunk(n)

    need = (2 * n * tile_k * x_b          # x slab (double buffered)
            + 2 * tile_k * tile_h * x_b   # W^T tile (double buffered)
            + 2 * n * tile_h * 4          # resident output block (+ writeback)
            + 4 * tile_h * 4)             # gamma / beta
    cost = pl.CostEstimate(
        flops=2 * n * in_feat * hidden,
        transcendentals=n * hidden,
        bytes_accessed=int(h_tiles * n * in_feat * x_b + in_feat * hidden * x_b
                           + n * hidden * 4 + 4 * hidden * 4),
    )
    kernel = functools.partial(_fused_enc_kernel, row_chunk=row_chunk)
    return pl.pallas_call(
        kernel,
        out_shape=jax.ShapeDtypeStruct((n, hidden), jnp.float32),
        grid_spec=pltpu.PrefetchScalarGridSpec(
            num_scalar_prefetch=0,
            grid=(h_tiles, k_tiles),
            in_specs=[
                pl.BlockSpec((n, tile_k), lambda j, k: (0, k)),       # x slab
                pl.BlockSpec((tile_k, tile_h), lambda j, k: (k, j)),  # W^T tile
                # j is the slowest grid axis -> these tiny blocks are only
                # DMA'd once per H tile (effectively constant).
                pl.BlockSpec((1, tile_h), lambda j, k: (0, j)),       # gamma
                pl.BlockSpec((1, tile_h), lambda j, k: (0, j)),       # beta
            ],
            out_specs=pl.BlockSpec((n, tile_h), lambda j, k: (0, j)),
        ),
        compiler_params=pltpu.CompilerParams(
            dimension_semantics=("parallel", "arbitrary"),
            vmem_limit_bytes=_vmem_limit(need),
        ),
        cost_estimate=cost,
    )(x_mm, w_mm, gamma2d, beta2d)


# ----------------------------------------------------------------------------
# two-pass path: N-blocked matmul + global BN stats, then normalize+tanh
# ----------------------------------------------------------------------------
def _mm_stats_kernel(x_ref, w_ref, y_ref, sum_ref, ssq_ref):
    """grid = (H_tiles, N_tiles, K_tiles), K last.

    y_ref block (i, j) is resident across K (accumulator); sum_ref / ssq_ref
    blocks (0, j) are resident across both N and K, so BN statistics are
    accumulated *globally* over the whole batch (not per N block).
    """
    i_n = pl.program_id(1)
    k = pl.program_id(2)

    @pl.when(k == 0)
    def _init_y():
        y_ref[...] = jnp.zeros_like(y_ref)

    y_ref[...] += jnp.dot(x_ref[...], w_ref[...], preferred_element_type=jnp.float32)

    @pl.when(jnp.logical_and(i_n == 0, k == 0))
    def _init_stats():
        sum_ref[...] = jnp.zeros_like(sum_ref)
        ssq_ref[...] = jnp.zeros_like(ssq_ref)

    @pl.when(k == pl.num_programs(2) - 1)
    def _accum_stats():
        y = y_ref[...]
        sum_ref[...] += jnp.sum(y, axis=0, keepdims=True)
        ssq_ref[...] += jnp.sum(y * y, axis=0, keepdims=True)


def _bn_tanh_kernel(y_ref, sum_ref, ssq_ref, gamma_ref, beta_ref, o_ref, *, inv_n):
    mean = sum_ref[...] * inv_n
    var = jnp.maximum(ssq_ref[...] * inv_n - mean * mean, 0.0)  # biased variance
    scale = gamma_ref[...] * lax.rsqrt(var + BN_EPS)
    shift = beta_ref[...] - mean * scale
    o_ref[...] = jnp.tanh(y_ref[...] * scale + shift).astype(o_ref.dtype)


def _two_pass_call(x_mm, w_mm, gamma2d, beta2d, n, in_feat, hidden,
                   tile_h, tile_k, block_n):
    x_b = x_mm.dtype.itemsize
    h_tiles = hidden // tile_h
    k_tiles = in_feat // tile_k
    n_tiles = n // block_n

    # ---- pass 1: N-blocked matmul + global per-feature sum / sum-of-squares
    need1 = (2 * block_n * tile_k * x_b + 2 * tile_k * tile_h * x_b
             + 2 * block_n * tile_h * 4 + 4 * tile_h * 4)
    cost1 = pl.CostEstimate(
        flops=2 * n * in_feat * hidden,
        transcendentals=0,
        bytes_accessed=int(n * in_feat * x_b + n_tiles * in_feat * hidden * x_b
                           + n * hidden * 4 + 4 * hidden * 4),
    )
    y_pre, ssum, ssq = pl.pallas_call(
        _mm_stats_kernel,
        out_shape=(
            jax.ShapeDtypeStruct((n, hidden), jnp.float32),
            jax.ShapeDtypeStruct((1, hidden), jnp.float32),
            jax.ShapeDtypeStruct((1, hidden), jnp.float32),
        ),
        grid_spec=pltpu.PrefetchScalarGridSpec(
            num_scalar_prefetch=0,
            grid=(h_tiles, n_tiles, k_tiles),
            in_specs=[
                pl.BlockSpec((block_n, tile_k), lambda j, i, k: (i, k)),
                pl.BlockSpec((tile_k, tile_h), lambda j, i, k: (k, j)),
            ],
            out_specs=(
                pl.BlockSpec((block_n, tile_h), lambda j, i, k: (i, j)),
                pl.BlockSpec((1, tile_h), lambda j, i, k: (0, j)),
                pl.BlockSpec((1, tile_h), lambda j, i, k: (0, j)),
            ),
        ),
        compiler_params=pltpu.CompilerParams(
            dimension_semantics=("parallel", "arbitrary", "arbitrary"),
            vmem_limit_bytes=_vmem_limit(need1),
        ),
        cost_estimate=cost1,
    )(x_mm, w_mm)

    # ---- pass 2: normalize + affine + tanh (elementwise, fully parallel)
    need2 = 2 * 2 * block_n * tile_h * 4 + 8 * tile_h * 4
    cost2 = pl.CostEstimate(
        flops=6 * n * hidden,
        transcendentals=n * hidden,
        bytes_accessed=int(2 * n * hidden * 4 + 4 * hidden * 4),
    )
    kernel2 = functools.partial(_bn_tanh_kernel, inv_n=1.0 / n)
    return pl.pallas_call(
        kernel2,
        out_shape=jax.ShapeDtypeStruct((n, hidden), jnp.float32),
        grid_spec=pltpu.PrefetchScalarGridSpec(
            num_scalar_prefetch=0,
            grid=(n_tiles, h_tiles),
            in_specs=[
                pl.BlockSpec((block_n, tile_h), lambda i, j: (i, j)),
                pl.BlockSpec((1, tile_h), lambda i, j: (0, j)),
                pl.BlockSpec((1, tile_h), lambda i, j: (0, j)),
                pl.BlockSpec((1, tile_h), lambda i, j: (0, j)),
                pl.BlockSpec((1, tile_h), lambda i, j: (0, j)),
            ],
            out_specs=pl.BlockSpec((block_n, tile_h), lambda i, j: (i, j)),
        ),
        compiler_params=pltpu.CompilerParams(
            dimension_semantics=("parallel", "parallel"),
            vmem_limit_bytes=_vmem_limit(need2),
        ),
        cost_estimate=cost2,
    )(y_pre, ssum, ssq, gamma2d, beta2d)


# ----------------------------------------------------------------------------
# public wrapper
# ----------------------------------------------------------------------------
def instrument_backbone_enc(x, w_t, gamma, beta, shapes, *,
                            tile_h=None, tile_k=None, block_n=None,
                            compute_dtype=jnp.bfloat16):
    """Pallas implementation of `_InstrumentBackboneEnc.forward`.

    Args:
      x:      (nb_frames, nb_samples, nb_channels, nb_bins) f32 spectrogram.
      w_t:    (in_features, hidden) — transposed torch Linear weight
              (torch stores (hidden, in_features); y = x @ W.T).
      gamma:  (hidden,) BatchNorm1d weight.
      beta:   (hidden,) BatchNorm1d bias.
      shapes: (nb_frames, nb_samples, nb_channels, nb_bins).
      tile_h / tile_k: optional overrides (multiples of 128 dividing extents).
      block_n: rows per N block; if set (or if the whole batch exceeds the
        VMEM budget) the N-blocked two-pass BatchNorm path is used.
      compute_dtype: dtype of the matmul *operands* (None keeps the input
        dtype); accumulation and all BN math are always f32.
    Returns:
      (nb_frames, nb_samples, hidden) f32.
    """
    nb_frames, nb_samples, nb_channels, nb_bins = shapes
    hidden = w_t.shape[1]
    in_feat = nb_channels * nb_bins

    # Same flatten as torch's x.reshape(-1, nb_channels * max_bin).
    x2d = x.reshape(-1, in_feat)
    n = x2d.shape[0]

    if compute_dtype is not None:
        x_mm = x2d.astype(compute_dtype)
        w_mm = w_t.astype(compute_dtype)
    else:
        x_mm, w_mm = x2d, w_t
    x_b = jnp.dtype(x_mm.dtype).itemsize

    if tile_h is None:
        # >=256-wide H tiles to feed the 256x256 MXU and cut x re-streaming,
        # but keep >=2 H tiles for large `hidden` so the "parallel" axis can
        # still shard across v7x's two TensorCores.
        tile_h = _pick_tile(hidden, max(256, hidden // 2) if hidden > 256 else hidden)
    if tile_k is None:
        tile_k = _pick_tile(in_feat, 512)
    assert hidden % tile_h == 0 and in_feat % tile_k == 0

    gamma2d = gamma.reshape(1, hidden).astype(jnp.float32)
    beta2d = beta.reshape(1, hidden).astype(jnp.float32)

    fused_need = (2 * n * tile_k * x_b + 2 * tile_k * tile_h * x_b
                  + 2 * n * tile_h * 4 + 4 * tile_h * 4)
    if block_n is None and fused_need > _FUSED_VMEM_BUDGET:
        step = 8 * (4 // x_b)  # sublane packing: 8 rows (f32) / 16 rows (bf16)
        block_n = _largest_dividing_multiple(n, 1024, step)
        # TODO(synk): if N has no suitable divisor, pad the batch instead of
        # falling back to the (possibly VMEM-tight) fused path.

    if block_n is None or block_n >= n:
        out = _fused_call(x_mm, w_mm, gamma2d, beta2d, n, in_feat, hidden,
                          tile_h, tile_k)
    else:
        assert n % block_n == 0 and block_n % 8 == 0, "block_n must divide N (mult of 8)"
        out = _two_pass_call(x_mm, w_mm, gamma2d, beta2d, n, in_feat, hidden,
                             tile_h, tile_k, block_n)

    return out.reshape(nb_frames, nb_samples, hidden)


# ----------------------------------------------------------------------------
# pure-JAX reference of the torch forward (training-mode BatchNorm)
# ----------------------------------------------------------------------------
def _reference(x, w_t, gamma, beta, shapes):
    nb_frames, nb_samples, nb_channels, nb_bins = shapes
    y = x.reshape(-1, nb_channels * nb_bins) @ w_t
    mean = jnp.mean(y, axis=0, keepdims=True)
    var = jnp.mean((y - mean) ** 2, axis=0, keepdims=True)
    y = (y - mean) / jnp.sqrt(var + BN_EPS) * gamma[None, :] + beta[None, :]
    return jnp.tanh(y).reshape(nb_frames, nb_samples, -1)


if __name__ == "__main__":
    # Small, tile-friendly shapes consistent with the module
    # (hidden_size=512 is the torch default; nb_channels=2, nb_bins=128).
    nb_frames, nb_samples, nb_channels, nb_bins = 8, 2, 2, 128
    hidden = 512
    in_feat = nb_channels * nb_bins
    shapes = (nb_frames, nb_samples, nb_channels, nb_bins)

    key = jax.random.PRNGKey(0)
    kx, kw, kg, kb = jax.random.split(key, 4)

    x = jax.random.normal(kx, (nb_frames, nb_samples, nb_channels, nb_bins),
                          dtype=jnp.float32)
    w = jax.random.normal(kw, (hidden, in_feat), dtype=jnp.float32) / jnp.sqrt(in_feat)
    w_t = w.T                                              # (in_feat, hidden)
    gamma = 1.0 + 0.1 * jax.random.normal(kg, (hidden,), dtype=jnp.float32)
    beta = 0.1 * jax.random.normal(kb, (hidden,), dtype=jnp.float32)

    ref = _reference(x, w_t, gamma, beta, shapes)

    # 1) fused path, exact f32 matmul — tight tolerance.
    run_f32 = jax.jit(functools.partial(instrument_backbone_enc, shapes=shapes,
                                        compute_dtype=None))
    out = jax.block_until_ready(run_f32(x, w_t, gamma, beta))
    assert out.shape == (nb_frames, nb_samples, hidden)
    assert jnp.allclose(out, ref, atol=1e-5, rtol=1e-5), "f32 fused mismatch"

    # 2) fused path, bf16 matmul operands / f32 accumulation (default fast path).
    run_bf16 = jax.jit(functools.partial(instrument_backbone_enc, shapes=shapes))
    out_bf16 = jax.block_until_ready(run_bf16(x, w_t, gamma, beta))
    assert out_bf16.shape == (nb_frames, nb_samples, hidden)
    assert jnp.allclose(out_bf16, ref, atol=5e-2, rtol=5e-2), "bf16 fused mismatch"

    # 3) N-blocked two-pass path (global BN stats accumulated across N blocks).
    run_2p = jax.jit(functools.partial(instrument_backbone_enc, shapes=shapes,
                                       compute_dtype=None, block_n=8))
    out_2p = jax.block_until_ready(run_2p(x, w_t, gamma, beta))
    assert jnp.allclose(out_2p, ref, atol=1e-4, rtol=1e-4), "two-pass mismatch"

    print("KERNEL_OK")
</pallas_src>

<mosaic_0001>
module attributes {stable_mosaic.version = 11 : i64} {
  func.func @_fused_enc_kernel(%arg0: i32, %arg1: i32, %arg2: memref<16x256xf32, #tpu.memory_space<vmem>>, %arg3: memref<256x256xf32, #tpu.memory_space<vmem>>, %arg4: memref<1x256xf32, #tpu.memory_space<vmem>>, %arg5: memref<1x256xf32, #tpu.memory_space<vmem>>, %arg6: memref<16x256xf32, #tpu.memory_space<vmem>>) attributes {dimension_semantics = [#tpu.dimension_semantics<parallel>, #tpu.dimension_semantics<arbitrary>], iteration_bounds = array<i64: 2, 1>, scalar_prefetch = 0 : i64, scratch_operands = 0 : i64, tpu.core_type = #tpu.core_type<tc>, window_params = [{transform_indices = @transform_0, window_bounds = array<i64: 16, 256>}, {transform_indices = @transform_1, window_bounds = array<i64: 256, 256>}, {transform_indices = @transform_2, window_bounds = array<i64: 1, 256>}, {transform_indices = @transform_3, window_bounds = array<i64: 1, 256>}, {transform_indices = @transform_4, window_bounds = array<i64: 16, 256>}]} {
    %c0_i32 = arith.constant 0 : i32
    %0 = arith.cmpi eq, %arg1, %c0_i32 : i32
    %1 = arith.extui %0 : i1 to i32
    %c0_i32_0 = arith.constant 0 : i32
    %2 = arith.cmpi ne, %1, %c0_i32_0 : i32
    scf.if %2 {
      %cst_10 = arith.constant 0.000000e+00 : f32
      %12 = vector.broadcast %cst_10 : f32 to vector<16x256xf32>
      %c0_11 = arith.constant 0 : index
      %c0_12 = arith.constant 0 : index
      %13 = vector.load %arg6[%c0_11, %c0_12] : memref<16x256xf32, #tpu.memory_space<vmem>>, vector<16x256xf32>
      tpu.vector_store %arg6[%c0_11, %c0_12], %12 {strides = array<i32>} : memref<16x256xf32, #tpu.memory_space<vmem>>, vector<16x256xf32>,
    } else {
    }
    %c0 = arith.constant 0 : index
    %c0_1 = arith.constant 0 : index
    %3 = vector.load %arg6[%c0, %c0_1] : memref<16x256xf32, #tpu.memory_space<vmem>>, vector<16x256xf32>
    %c0_2 = arith.constant 0 : index
    %c0_3 = arith.constant 0 : index
    %4 = vector.load %arg2[%c0_2, %c0_3] : memref<16x256xf32, #tpu.memory_space<vmem>>, vector<16x256xf32>
    %c0_4 = arith.constant 0 : index
    %c0_5 = arith.constant 0 : index
    %5 = vector.load %arg3[%c0_4, %c0_5] : memref<256x256xf32, #tpu.memory_space<vmem>>, vector<256x256xf32>
    %cst = arith.constant dense<0.000000e+00> : vector<16x256xf32>
    %6 = tpu.matmul %4, %5, %cst {dimension_numbers = #tpu.dot_dimension_numbers<[1], [0], [0], [1], [0, 0, 1, 1], [], []>} : vector<16x256xf32>, vector<256x256xf32>, vector<16x256xf32> -> vector<16x256xf32>
    %7 = arith.addf %3, %6 : vector<16x256xf32>
    %c0_6 = arith.constant 0 : index
    %c0_7 = arith.constant 0 : index
    %8 = vector.load %arg6[%c0_6, %c0_7] : memref<16x256xf32, #tpu.memory_space<vmem>>, vector<16x256xf32>
    tpu.vector_store %arg6[%c0_6, %c0_7], %7 {strides = array<i32>} : memref<16x256xf32, #tpu.memory_space<vmem>>, vector<16x256xf32>,
    %c0_i32_8 = arith.constant 0 : i32
    %9 = arith.cmpi eq, %arg1, %c0_i32_8 : i32
    %10 = arith.extui %9 : i1 to i32
    %c0_i32_9 = arith.constant 0 : i32
    %11 = arith.cmpi ne, %10, %c0_i32_9 : i32
    scf.if %11 {
      %c0_10 = arith.constant 0 : index
      %c0_11 = arith.constant 0 : index
      %12 = vector.load %arg6[%c0_10, %c0_11] : memref<16x256xf32, #tpu.memory_space<vmem>>, vector<16x256xf32>
      %cst_12 = arith.constant dense<0.000000e+00> : vector<256xf32>
      %13 = vector.multi_reduction <add>, %12, %cst_12 [0] : vector<16x256xf32> to vector<256xf32>
      %14 = vector.shape_cast %13 : vector<256xf32> to vector<1x256xf32>
      %cst_13 = arith.constant 1.600000e+01 : f32
      %15 = vector.broadcast %cst_13 : f32 to vector<1x256xf32>
      %16 = arith.divf %14, %15 : vector<1x256xf32>
      %17 = vector.broadcast %16 : vector<1x256xf32> to vector<16x256xf32>
      %18 = arith.subf %12, %17 : vector<16x256xf32>
      %19 = arith.mulf %18, %18 : vector<16x256xf32>
      %cst_14 = arith.constant dense<0.000000e+00> : vector<256xf32>
      %20 = vector.multi_reduction <add>, %19, %cst_14 [0] : vector<16x256xf32> to vector<256xf32>
      %21 = vector.shape_cast %20 : vector<256xf32> to vector<1x256xf32>
      %cst_15 = arith.constant 1.600000e+01 : f32
      %22 = vector.broadcast %cst_15 : f32 to vector<1x256xf32>
      %23 = arith.divf %21, %22 : vector<1x256xf32>
      %c0_16 = arith.constant 0 : index
      %c0_17 = arith.constant 0 : index
      %24 = vector.load %arg4[%c0_16, %c0_17] : memref<1x256xf32, #tpu.memory_space<vmem>>, vector<1x256xf32>
      %cst_18 = arith.constant 9.99999974E-6 : f32
      %25 = vector.broadcast %cst_18 : f32 to vector<1x256xf32>
      %26 = arith.addf %23, %25 : vector<1x256xf32>
      %27 = math.rsqrt %26 : vector<1x256xf32>
      %28 = arith.mulf %24, %27 : vector<1x256xf32>
      %c0_19 = arith.constant 0 : index
      %c0_20 = arith.constant 0 : index
      %29 = vector.load %arg5[%c0_19, %c0_20] : memref<1x256xf32, #tpu.memory_space<vmem>>, vector<1x256xf32>
      %30 = arith.mulf %16, %28 : vector<1x256xf32>
      %31 = arith.subf %29, %30 : vector<1x256xf32>
      %c0_i32_21 = arith.constant 0 : i32
      %c16_i32 = arith.constant 16 : i32
      %32 = arith.muli %c0_i32_21, %c16_i32 : i32
      %33 = tpu.assume_multiple %32, 16 : i32
      %34 = arith.index_cast %33 : i32 to index
      %c0_22 = arith.constant 0 : index
      %35 = vector.load %arg6[%34, %c0_22] : memref<16x256xf32, #tpu.memory_space<vmem>>, vector<16x256xf32>
      %36 = vector.broadcast %28 : vector<1x256xf32> to vector<16x256xf32>
      %37 = arith.mulf %35, %36 : vector<16x256xf32>
      %38 = vector.broadcast %31 : vector<1x256xf32> to vector<16x256xf32>
      %39 = arith.addf %37, %38 : vector<16x256xf32>
      %40 = math.tanh %39 : vector<16x256xf32>
      %41 = arith.index_cast %33 : i32 to index
      %c0_23 = arith.constant 0 : index
      %42 = vector.load %arg6[%41, %c0_23] : memref<16x256xf32, #tpu.memory_space<vmem>>, vector<16x256xf32>
      tpu.vector_store %arg6[%41, %c0_23], %40 {strides = array<i32>} : memref<16x256xf32, #tpu.memory_space<vmem>>, vector<16x256xf32>,
      %c1_i32 = arith.constant 1 : i32
    } else {
    }
    return
  }
  func.func @transform_0(%arg0: i32, %arg1: i32) -> (i32, i32) {
    %c0_i32 = arith.constant 0 : i32
    %c0_i32_0 = arith.constant 0 : i32
    return %c0_i32, %arg1 : i32, i32
  }
  func.func @transform_1(%arg0: i32, %arg1: i32) -> (i32, i32) {
    %c0_i32 = arith.constant 0 : i32
    return %arg1, %arg0 : i32, i32
  }
  func.func @transform_2(%arg0: i32, %arg1: i32) -> (i32, i32) {
    %c0_i32 = arith.constant 0 : i32
    %c0_i32_0 = arith.constant 0 : i32
    return %c0_i32, %arg0 : i32, i32
  }
  func.func @transform_3(%arg0: i32, %arg1: i32) -> (i32, i32) {
    %c0_i32 = arith.constant 0 : i32
    %c0_i32_0 = arith.constant 0 : i32
    return %c0_i32, %arg0 : i32, i32
  }
  func.func @transform_4(%arg0: i32, %arg1: i32) -> (i32, i32) {
    %c0_i32 = arith.constant 0 : i32
    %c0_i32_0 = arith.constant 0 : i32
    return %c0_i32, %arg0 : i32, i32
  }
}

</mosaic_0001>

<bundles_post_ra>
// kernel: instrument_backbone_enc.1
= control target key start
LH: loop header
LB: loop body
LE: loop exit
PB: predicated region body
PF: predicated region fallthrough
CT: control target
= control target key end

     0   :  { %9 = vsyncpa [#allocation3], 0  ;;  %s1276_s0 = inlined_call_operand.vmem [shape: f32[16,256], index: 0, kind: input, shape index: {}]   ;;  %s1277_s1 = inlined_call_operand.hbm [shape: f32[256,512], index: 1, kind: input, shape index: {}]   ;;  %s1278_s2 = inlined_call_operand.vmem [shape: f32[1,512], index: 2, kind: input, shape index: {}]   ;;  %s1279_s3 = inlined_call_operand.vmem [shape: f32[1,512], index: 3, kind: input, shape index: {}]   ;;  %s1280_s4 = inlined_call_operand.vmem [shape: f32[16,512], index: 4, kind: output, shape index: {}]  }
   0x1   :  { %11 = vsyncpa [#allocation3 + $0x1], 0  ;;  %s1035_s15 = smov 0   ;;  %s1037_s16 = smov 0  }
   0x2   :  { %s1039_s17 = smov 0   ;;  %s1041_s18 = smov 0  }
   0x3   :  { %s1043_s19 = smov 0   ;;  %s1045_s20 = smov 0  }
   0x4 LB: > { %s735_s21 = sadd.s32 4294967295, %s1003_s20   ;;  %s29_s22 = sadd.s32 1, %s999_s19  ;;  %s1003_s20 = sphi %s1045_s20, %s17_s20   ;;  %s999_s19 = sphi %s1043_s19, %s1291_s19   ;;  %s995_s18 = sphi %s1041_s18, %s1290_s18   ;;  %s991_s17 = sphi %s1039_s17, %s1289_s17   ;;  %s987_s16 = sphi %s1037_s16, %s1288_s16   ;;  %s983_s15 = sphi %s1035_s15, %s1287_s15  }
   0x5   : > { %p31_p0 = scmp.ge.s32.totalorder %s29_s22, 2  ;;  %s64_s23 = sadd.s32 1, %s991_s17 }
   0x6   : > { %p71_p1 = scmp.ne.s32.totalorder %s991_s17, %s987_s16  ;;  %p72_p2 = scmp.eq.s32.totalorder %s1003_s20, 0 }
   0x7   : > { %s1293_s22 = smov (%p31_p0, %s29_s22), 0  ;;  %p77_p4 = scmp.ne.s32.totalorder %s987_s16, %s983_s15 }
   0x8   : > { %p1071_p3 = por %p72_p2, %p71_p1  ;;  %s60_s25 = ssub.s32 %s999_s19, %s1293_s22 }
   0x9   : > { %p78_p5 = scmp.eq.s32.totalorder %s735_s21, 0  ;;  %p62_p6 = scmp.eq.s32.totalorder %s60_s25, 0 }
   0xa   : > { %p153_p7 = scmp.eq.s32.totalorder %s735_s21, 1  ;;  %p857_p10 = scmp.lt.s32.totalorder %s1003_s20, 2 }
   0xb   : > { %p1078_p8 = por %p78_p5, %p77_p4  ;;  %s188_s29 = sand.u32 1, %s991_s17  }
   0xc   : > { %s1083_s27 = scalar_select %p62_p6, %s991_s17, %s64_s23  }
   0xd   : > { %p1085_p9 = por %p153_p7, %p71_p1  ;;  %s753_s30 = sshll.u32 %s999_s19, 8 }
   0xe   : > { %s740_s5 = sshll.u32 %s188_s29, 9  ;;  %s1095_s8 = scalar_lea.hbm %s1277_s1, %s753_s30 }
   0xf   : > { %s1283_s28 = scalar_select %p1085_p9, 1, 0 }
  0x10   : > { %s192_s9 = scalar_lea.vmem [#allocation2], %s740_s5  ;;  %p1099_p11 = pnand %p857_p10, %p1071_p3 }
  0x11   : > { %s202_s10 = sshll.u32 %s192_s9, 4  ;;  %s1106_s12 = scalar_lea.sflag [#allocation3], %s188_s29  ;;  %s1103_s10 = int_to_ptr.vmem [resolvable:$true] %s202_s10 }
  0x12   : > { %s923_s13 = scalar_lea.hbm %s1095_s8, 8192  ;;  %p925_p0 = pneg %p1099_p11 }
  0x13   : > { %p924_p13 = scmp.ne.s32.totalorder %s1095_s8, %s923_s13  ;;  %s928_s21 = scalar_lea.hbm %s1277_s1, 16384 }
  0x14   : > { %p929_p3 = scmp.lt.u32.totalorder %s1095_s8, %s1277_s1  ;;  %p930_p4 = scmp.lt.u32.totalorder %s928_s21, %s923_s13 }
  0x15   : > { %p926_p1 = pnand %p925_p0, %p924_p13  ;;  %p932_p6 = scmp.lt.u32.totalorder %s923_s13, %s1095_s8 }
  0x16   : > { %p931_p5 = por %p930_p4, %p929_p3 }
  0x17   : > { %p927_p2 = pneg %p926_p1 }
  0x18   : > { %p933_p7 = por %p932_p6, %p931_p5 }
  0x1a   : > { %p934_p10 = pnand %p933_p7, %p927_p2 }
  0x1c   : > { %937 = shalt.err (!%p934_p10)
}
  0x1d   : > { %s938_s25 = scalar_lea.vmem %s1103_s10, 8192  ;;  %s1005_s29 = smov [#allocation2]  }
  0x1e   : > { %p939_p13 = scmp.ne.s32.totalorder %s1103_s10, %s938_s25  ;;  %s943_s30 = sshll.u32 %s1005_s29, 4  ;;  %s944_s30 = int_to_ptr.vmem [resolvable:$false] %s943_s30 }
  0x1f   : > { %s945_s5 = scalar_lea.vmem %s944_s30, 16384  ;;  %p946_p9 = scmp.lt.s32.totalorder %s1103_s10, %s944_s30 }
  0x20   : > { %p941_p1 = pnand %p939_p13, %p925_p0  ;;  %p947_p3 = scmp.lt.s32.totalorder %s945_s5, %s938_s25 }
  0x22   : > { %p942_p12 = pneg %p941_p1  ;;  %p948_p4 = por %p947_p3, %p946_p9 }
  0x24   : > { %p949_p5 = pnand %p948_p4, %p942_p12 }
  0x26   : > { %952 = shalt.err (!%p949_p5)
}
  0x27   : > { %s1006_s6 = smov 512   ;;  %s1007_s7 = smov 256  }
  0x28   : > { %s1008_s9 = smov 16   ;;  %p226_p0 = scmp.lt.s32.totalorder %s1003_s20, 3 }
  0x29   : > { %856 = dma.hbm_to_vmem [thread:$0]  (!%p1099_p11), %s1095_s8, 8192, %s1103_s10, %s1106_s12, %s1006_s6, %s1007_s7, %s1008_s9  }
  0x2a   : > { %p1285_p2 = scmp.ge.s32.totalorder %s1003_s20, 1 }
  0x2c   : > { %p227_p6 = pnand %p1285_p2, %p226_p0 }
  0x2d   : > { %s1138_s13 = sand.u32 (!%p227_p6), 1, %s987_s16  }
  0x2e   : > { %230 = sbr.rel (%p227_p6) target bundleno = 430 (0x1ae), region = 36  ;;  %s744_s14 = sshll.u32 (!%p227_p6), %s1138_s13, 9 }
  0x2f   : > { %s233_s15 = scalar_lea.sflag (!%p227_p6), [#allocation3], %s1138_s13  ;;  %s1142_s21 = scalar_lea.vmem (!%p227_p6), [#allocation2], %s744_s14 }
  0x35   : > { %978 = dma.done.wait (%p1078_p8), %s233_s15, 8192  }
  0x36   : > { %980 = vsyncadd (%p1078_p8), %s233_s15, 4294959104  ;;  %v309_v0 = vld [vmem:[%s1142_s21 + $0x8] sm:$0xff]  ;;  %v311_v1 = vld [vmem:[%s1142_s21 + $0x18] sm:$0xff]  ;;  %s746_s29 = sshll.u32 %s995_s18, 1  ;;  %s745_s15 = sshll.u32 %s1138_s13, 5 }
  0x37   : > { %v308_v2 = vld [vmem:[%s1142_s21] sm:$0xff]  ;;  %v755_v3 = vpack.c.bf16 %v311_v1, %v309_v0  ;;  %v310_v4 = vld [vmem:[%s1142_s21 + $0x10] sm:$0xff]  ;;  %v313_v5 = vld [vmem:[%s1142_s21 + $0x28] sm:$0xff]  ;;  %p282_p8 = scmp.lt.s32.totalorder %s746_s29, 3  ;;  %p1286_p9 = scmp.ne.s32.totalorder %s1283_s28, 0 }
  0x38   : > { %v315_v6 = vld [vmem:[%s1142_s21 + $0x38] sm:$0xff]  ;;  %v757_v7 = vpack.c.bf16 %v310_v4, %v308_v2  ;;  %v312_v9 = vld [vmem:[%s1142_s21 + $0x20] sm:$0xff]  ;;  %v314_v10 = vld [vmem:[%s1142_s21 + $0x30] sm:$0xff]  ;;  %s754_s26 = sshll.u32 (%p1286_p9), %s995_s18, 4 }
  0x39   : > { %v759_v8 = vpack.c.bf16 %v315_v6, %v313_v5  ;;  %v317_v11 = vld [vmem:[%s1142_s21 + $0x48] sm:$0xff]  ;;  %756 = vmatprep.subr.bf16.mxu0 %v755_v3  ;;  %819 = vmatprep.subr.bf16.mxu1 %v755_v3  ;;  %v319_v12 = vld [vmem:[%s1142_s21 + $0x58] sm:$0xff]  ;;  %v761_v13 = vpack.c.bf16 %v314_v10, %v312_v9  ;;  %v316_v15 = vld [vmem:[%s1142_s21 + $0x40] sm:$0xff]  ;;  %s1295_s29 = smov (!%p282_p8, %s746_s29), 3  ;;  %s605_s13 = scalar_lea.vmem (%p1286_p9), %s1280_s4, %s754_s26 }
  0x3a   : > { %758 = vmatpush1.bf16.msra.mxu0 %v757_v7  ;;  %835 = vmatpush1.bf16.msra.mxu1 %v757_v7  ;;  %v763_v14 = vpack.c.bf16 %v319_v12, %v317_v11  ;;  %v318_v16 = vld [vmem:[%s1142_s21 + $0x50] sm:$0xff]  ;;  %v321_v17 = vld [vmem:[%s1142_s21 + $0x68] sm:$0xff]  ;;  %v323_v18 = vld [vmem:[%s1142_s21 + $0x78] sm:$0xff]  ;;  %s284_s6 = scalar_lea.vmem %s1278_s2, %s1295_s29  ;;  %s289_s14 = scalar_lea.vmem %s1279_s3, %s1295_s29 }
  0x3b   : > { %760 = vmatprep.subr.bf16.mxu0 %v759_v8  ;;  %820 = vmatprep.subr.bf16.mxu1 %v759_v8  ;;  %v765_v19 = vpack.c.bf16 %v318_v16, %v316_v15  ;;  %v767_v20 = vpack.c.bf16 %v323_v18, %v321_v17  ;;  %v320_v21 = vld [vmem:[%s1142_s21 + $0x60] sm:$0xff]  ;;  %v322_v22 = vld [vmem:[%s1142_s21 + $0x70] sm:$0xff]  ;;  %v325_v23 = vld [vmem:[%s1142_s21 + $0x88] sm:$0xff] }
  0x3c   : > { %v327_v24 = vld [vmem:[%s1142_s21 + $0x98] sm:$0xff]  ;;  %v769_v25 = vpack.c.bf16 %v322_v22, %v320_v21  ;;  %v324_v27 = vld [vmem:[%s1142_s21 + $0x80] sm:$0xff]  ;;  %v326_v28 = vld [vmem:[%s1142_s21 + $0x90] sm:$0xff] }
  0x3d   : > { %v771_v26 = vpack.c.bf16 %v327_v24, %v325_v23  ;;  %v329_v29 = vld [vmem:[%s1142_s21 + $0xa8] sm:$0xff]  ;;  %v331_v30 = vld [vmem:[%s1142_s21 + $0xb8] sm:$0xff]  ;;  %v773_v31 = vpack.c.bf16 %v326_v28, %v324_v27  ;;  %v328_v33 = vld [vmem:[%s1142_s21 + $0xa0] sm:$0xff] }
  0x3e   : > { %762 = vmatpush1.bf16.msra.mxu0 %v761_v13  ;;  %836 = vmatpush1.bf16.msra.mxu1 %v761_v13  ;;  %v775_v32 = vpack.c.bf16 %v331_v30, %v329_v29  ;;  %v330_v34 = vld [vmem:[%s1142_s21 + $0xb0] sm:$0xff]  ;;  %v333_v35 = vld [vmem:[%s1142_s21 + $0xc8] sm:$0xff]  ;;  %v335_v36 = vld [vmem:[%s1142_s21 + $0xd8] sm:$0xff] }
  0x3f   : > { %764 = vmatprep.subr.bf16.mxu0 %v763_v14  ;;  %821 = vmatprep.subr.bf16.mxu1 %v763_v14  ;;  %v777_v37 = vpack.c.bf16 %v330_v34, %v328_v33  ;;  %v332_v38 = vld [vmem:[%s1142_s21 + $0xc0] sm:$0xff]  ;;  %v779_v39 = vpack.c.bf16 %v335_v36, %v333_v35  ;;  %v334_v40 = vld [vmem:[%s1142_s21 + $0xd0] sm:$0xff]  ;;  %v305_v41 = vld [vmem:[%s1276_s0 + $0x8] sm:$0xff] }
  0x40   : > { %v307_v42 = vld [vmem:[%s1276_s0 + $0x18] sm:$0xff]  ;;  %v337_v43 = vld [vmem:[%s1142_s21 + $0xe8] sm:$0xff]  ;;  %436 = vmatprep.mubr.f32.mxu0 %v305_v41  ;;  %v781_v45 = vpack.c.bf16 %v334_v40, %v332_v38  ;;  %v336_v47 = vld [vmem:[%s1142_s21 + $0xe0] sm:$0xff] }
  0x41   : > { %v339_v44 = vld [vmem:[%s1142_s21 + $0xf8] sm:$0xff]  ;;  %442 = vmatprep.mubr.f32.mxu1 %v307_v42  ;;  %v338_v48 = vld [vmem:[%s1142_s21 + $0xf0] sm:$0xff]  ;;  %v341_v49 = vld [vmem:[%s1142_s21 + $0x108] sm:$0xff] }
  0x42   : > { %766 = vmatpush1.bf16.msra.mxu0 %v765_v19  ;;  %837 = vmatpush1.bf16.msra.mxu1 %v765_v19  ;;  %v783_v46 = vpack.c.bf16 %v339_v44, %v337_v43  ;;  %v343_v50 = vld [vmem:[%s1142_s21 + $0x118] sm:$0xff]  ;;  %v785_v51 = vpack.c.bf16 %v338_v48, %v336_v47  ;;  %v340_v53 = vld [vmem:[%s1142_s21 + $0x100] sm:$0xff]  ;;  %v342_v54 = vld [vmem:[%s1142_s21 + $0x110] sm:$0xff] }
  0x43   : > { %768 = vmatprep.subr.bf16.mxu0 %v767_v20  ;;  %822 = vmatprep.subr.bf16.mxu1 %v767_v20  ;;  %v787_v52 = vpack.c.bf16 %v343_v50, %v341_v49  ;;  %v345_v55 = vld [vmem:[%s1142_s21 + $0x128] sm:$0xff]  ;;  %v347_v56 = vld [vmem:[%s1142_s21 + $0x138] sm:$0xff]  ;;  %v789_v57 = vpack.c.bf16 %v342_v54, %v340_v53  ;;  %v344_v59 = vld [vmem:[%s1142_s21 + $0x120] sm:$0xff] }
  0x44   : > { %v791_v58 = vpack.c.bf16 %v347_v56, %v345_v55  ;;  %v346_v60 = vld [vmem:[%s1142_s21 + $0x130] sm:$0xff]  ;;  %v349_v61 = vld [vmem:[%s1142_s21 + $0x148] sm:$0xff]  ;;  %v351_v62 = vld [vmem:[%s1142_s21 + $0x158] sm:$0xff] }
  0x45   : > { %v793_v63 = vpack.c.bf16 %v346_v60, %v344_v59  ;;  %v795_v0 = vpack.c.bf16 %v351_v62, %v349_v61  ;;  %v348_v1 = vld [vmem:[%s1142_s21 + $0x140] sm:$0xff]  ;;  %v350_v2 = vld [vmem:[%s1142_s21 + $0x150] sm:$0xff]  ;;  %v353_v3 = vld [vmem:[%s1142_s21 + $0x168] sm:$0xff] }
  0x46   : > { %770 = vmatpush1.bf16.msra.mxu0 %v769_v25  ;;  %838 = vmatpush1.bf16.msra.mxu1 %v769_v25  ;;  %v355_v4 = vld [vmem:[%s1142_s21 + $0x178] sm:$0xff]  ;;  %v797_v5 = vpack.c.bf16 %v350_v2, %v348_v1  ;;  %v352_v7 = vld [vmem:[%s1142_s21 + $0x160] sm:$0xff]  ;;  %v354_v8 = vld [vmem:[%s1142_s21 + $0x170] sm:$0xff] }
  0x47   : > { %772 = vmatprep.subr.bf16.mxu0 %v771_v26  ;;  %823 = vmatprep.subr.bf16.mxu1 %v771_v26  ;;  %v799_v6 = vpack.c.bf16 %v355_v4, %v353_v3  ;;  %v357_v9 = vld [vmem:[%s1142_s21 + $0x188] sm:$0xff]  ;;  %v359_v10 = vld [vmem:[%s1142_s21 + $0x198] sm:$0xff]  ;;  %v801_v11 = vpack.c.bf16 %v354_v8, %v352_v7  ;;  %v356_v13 = vld [vmem:[%s1142_s21 + $0x180] sm:$0xff] }
  0x48   : > { %v803_v12 = vpack.c.bf16 %v359_v10, %v357_v9  ;;  %v358_v14 = vld [vmem:[%s1142_s21 + $0x190] sm:$0xff]  ;;  %v361_v15 = vld [vmem:[%s1142_s21 + $0x1a8] sm:$0xff]  ;;  %v363_v16 = vld [vmem:[%s1142_s21 + $0x1b8] sm:$0xff] }
  0x49   : > { %v805_v17 = vpack.c.bf16 %v358_v14, %v356_v13  ;;  %v807_v18 = vpack.c.bf16 %v363_v16, %v361_v15  ;;  %v360_v19 = vld [vmem:[%s1142_s21 + $0x1a0] sm:$0xff]  ;;  %v362_v20 = vld [vmem:[%s1142_s21 + $0x1b0] sm:$0xff]  ;;  %v365_v21 = vld [vmem:[%s1142_s21 + $0x1c8] sm:$0xff] }
  0x4a   : > { %774 = vmatpush1.bf16.msra.mxu0 %v773_v31  ;;  %839 = vmatpush1.bf16.msra.mxu1 %v773_v31  ;;  %v367_v22 = vld [vmem:[%s1142_s21 + $0x1d8] sm:$0xff]  ;;  %v809_v23 = vpack.c.bf16 %v362_v20, %v360_v19  ;;  %v364_v25 = vld [vmem:[%s1142_s21 + $0x1c0] sm:$0xff]  ;;  %v366_v26 = vld [vmem:[%s1142_s21 + $0x1d0] sm:$0xff]  ;;  %v516_v20 = vlaneseq }
  0x4b   : > { %776 = vmatprep.subr.bf16.mxu0 %v775_v32  ;;  %824 = vmatprep.subr.bf16.mxu1 %v775_v32  ;;  %v811_v24 = vpack.c.bf16 %v367_v22, %v365_v21  ;;  %v369_v27 = vld [vmem:[%s1142_s21 + $0x1e8] sm:$0xff]  ;;  %v371_v28 = vld [vmem:[%s1142_s21 + $0x1f8] sm:$0xff]  ;;  %v813_v29 = vpack.c.bf16 %v366_v26, %v364_v25  ;;  %v368_v31 = vld [vmem:[%s1142_s21 + $0x1e0] sm:$0xff] }
  0x4c   : > { %v815_v30 = vpack.c.bf16 %v371_v28, %v369_v27  ;;  %v370_v32 = vld [vmem:[%s1142_s21 + $0x1f0] sm:$0xff]  ;;  %v304_v34 = vld [vmem:[%s1276_s0] sm:$0xff]  ;;  %v517_v22 = vshrl.u32 %v516_v20, 7  ;;  %s272_s21 = scalar_lea.vmem [#allocation4], %s745_s15 }
  0x4d   : > { %v817_v33 = vpack.c.bf16 %v370_v32, %v368_v31  ;;  %v306_v35 = vld [vmem:[%s1276_s0 + $0x10] sm:$0xff]  ;;  %v505_v28 = vld [vmem:[%s284_s6] sm:$0x3] }
  0x4e   : > { %778 = vmatpush1.bf16.msra.mxu0 %v777_v37  ;;  %840 = vmatpush1.bf16.msra.mxu1 %v777_v37  ;;  %v537_v31 = vsub.s32 1, %v517_v22 }
  0x4f   : > { %780 = vmatprep.subr.bf16.mxu0 %v779_v39  ;;  %825 = vmatprep.subr.bf16.mxu1 %v779_v39 }
  0x52   : > { %782 = vmatpush1.bf16.msra.mxu0 %v781_v45  ;;  %841 = vmatpush1.bf16.msra.mxu1 %v781_v45 }
  0x53   : > { %784 = vmatprep.subr.bf16.mxu0 %v783_v46  ;;  %826 = vmatprep.subr.bf16.mxu1 %v783_v46 }
  0x56   : > { %786 = vmatpush1.bf16.msra.mxu0 %v785_v51  ;;  %842 = vmatpush1.bf16.msra.mxu1 %v785_v51 }
  0x57   : > { %788 = vmatprep.subr.bf16.mxu0 %v787_v52  ;;  %827 = vmatprep.subr.bf16.mxu1 %v787_v52 }
  0x5a   : > { %790 = vmatpush1.bf16.msra.mxu0 %v789_v57  ;;  %843 = vmatpush1.bf16.msra.mxu1 %v789_v57 }
  0x5b   : > { %792 = vmatprep.subr.bf16.mxu0 %v791_v58  ;;  %828 = vmatprep.subr.bf16.mxu1 %v791_v58 }
  0x5e   : > { %794 = vmatpush1.bf16.msra.mxu0 %v793_v63  ;;  %844 = vmatpush1.bf16.msra.mxu1 %v793_v63 }
  0x5f   : > { %796 = vmatprep.subr.bf16.mxu0 %v795_v0  ;;  %829 = vmatprep.subr.bf16.mxu1 %v795_v0 }
  0x62   : > { %798 = vmatpush1.bf16.msra.mxu0 %v797_v5  ;;  %845 = vmatpush1.bf16.msra.mxu1 %v797_v5 }
  0x63   : > { %800 = vmatprep.subr.bf16.mxu0 %v799_v6  ;;  %830 = vmatprep.subr.bf16.mxu1 %v799_v6 }
  0x66   : > { %802 = vmatpush1.bf16.msra.mxu0 %v801_v11  ;;  %846 = vmatpush1.bf16.msra.mxu1 %v801_v11 }
  0x67   : > { %804 = vmatprep.subr.bf16.mxu0 %v803_v12  ;;  %831 = vmatprep.subr.bf16.mxu1 %v803_v12 }
  0x6a   : > { %806 = vmatpush1.bf16.msra.mxu0 %v805_v17  ;;  %847 = vmatpush1.bf16.msra.mxu1 %v805_v17 }
  0x6b   : > { %808 = vmatprep.subr.bf16.mxu0 %v807_v18  ;;  %832 = vmatprep.subr.bf16.mxu1 %v807_v18  ;;  %v1009_v18 = vmov 1966171168  }
  0x6c   : > { %v514_v19 = vunpack.c.l.s4 %v1009_v18 }
  0x6e   : > { %810 = vmatpush1.bf16.msra.mxu0 %v809_v23  ;;  %848 = vmatpush1.bf16.msra.mxu1 %v809_v23  ;;  %v515_v21 = vunpack.c.0.s8 %v514_v19 }
  0x6f   : > { %812 = vmatprep.subr.bf16.mxu0 %v811_v24  ;;  %833 = vmatprep.subr.bf16.mxu1 %v811_v24 }
  0x70   : > { %v518_v24 = vsub.s32 %v515_v21, %v517_v22 }
  0x72   : > { %814 = vmatpush1.bf16.msra.mxu0 %v813_v29  ;;  %849 = vmatpush1.bf16.msra.mxu1 %v813_v29 }
  0x73   : > { %816 = vmatprep.subr.bf16.mxu0 %v815_v30  ;;  %834 = vmatprep.subr.bf16.mxu1 %v815_v30  ;;  %v533_v30 = vsub.s32 0, %v517_v22 }
  0x76   : > { %818 = vmatpush1.bf16.msra.mxu0 %v817_v33  ;;  %850 = vmatpush1.bf16.msra.mxu1 %v817_v33 }
  0x79   : > { %437 = vmatmul.mubr.f32.vlgmr.msra.gmra.mrb[0].mxu0 %v304_v34  ;;  %443 = vmatmul.mubr.f32.vlgmr.msra.gmra.mrb[0].mxu1 %v306_v35 }
 0x14c   : > { %v1224_v36 = vpop.f32.mrb[0].mxu0  ;;  %v1226_v37 = vpop.f32.mrb[0].mxu1 }
 0x14d   : > { %v1228_v38 = vpop.f32.mrb[1].mxu0  ;;  %v1230_v39 = vpop.f32.mrb[1].mxu1  ;;  %v464_v40 = vadd.f32 %v1226_v37, %v1224_v36 }
 0x14e   : > { %v471_v41 = vadd.f32 %v1230_v39, %v1228_v38 }
 0x14f   : > { %v465_v42 = vrot.slane %v464_v40, 4 }
 0x150   : > { %v472_v43 = vrot.slane %v471_v41, 4 }
 0x151   : > { %v466_v44 = vadd.f32 %v465_v42, %v464_v40 }
 0x152   : > { %v473_v45 = vadd.f32 %v472_v43, %v471_v41 }
 0x153   : > { %v467_v46 = vrot.slane %v466_v44, 2 }
 0x154   : > { %v474_v47 = vrot.slane %v473_v45, 2 }
 0x155   : > { %v468_v48 = vadd.f32 %v467_v46, %v466_v44 }
 0x156   : > { %v475_v49 = vadd.f32 %v474_v47, %v473_v45  ;;  %v529_v47 = vld [vmem:[%s289_s14] sm:$0x3] }
 0x157   : > { %v469_v50 = vrot.slane %v468_v48, 1 }
 0x158   : > { %v476_v51 = vrot.slane %v475_v49, 1 }
 0x159   : > { %v470_v52 = vadd.f32 %v469_v50, %v468_v48 }
 0x15a   : > { %v477_v53 = vadd.f32 %v476_v51, %v475_v49 }
 0x15b   : > { %v479_v54 = vmul.f32 0.0625, %v470_v52 }
 0x15c   : > { %v480_v55 = vmul.f32 0.0625, %v477_v53 }
 0x15d   : > { %v481_v56 = vsub.f32 %v1224_v36, %v479_v54  ;;  %v483_v57 = vsub.f32 %v1226_v37, %v479_v54 }
 0x15e   : > { %v482_v58 = vsub.f32 %v1228_v38, %v480_v55  ;;  %v484_v59 = vsub.f32 %v1230_v39, %v480_v55 }
 0x15f   : > { %v485_v60 = vmul.f32 %v481_v56, %v481_v56  ;;  %v487_v61 = vmul.f32 %v483_v57, %v483_v57 }
 0x160   : > { %v486_v62 = vmul.f32 %v482_v58, %v482_v58  ;;  %v488_v63 = vmul.f32 %v484_v59, %v484_v59 }
 0x161   : > { %v489_v0 = vadd.f32 %v487_v61, %v485_v60 }
 0x162   : > { %v496_v1 = vadd.f32 %v488_v63, %v486_v62 }
 0x163   : > { %v490_v2 = vrot.slane %v489_v0, 4 }
 0x164   : > { %v497_v3 = vrot.slane %v496_v1, 4 }
 0x165   : > { %v491_v4 = vadd.f32 %v490_v2, %v489_v0 }
 0x166   : > { %v498_v5 = vadd.f32 %v497_v3, %v496_v1 }
 0x167   : > { %v492_v6 = vrot.slane %v491_v4, 2 }
 0x168   : > { %v499_v7 = vrot.slane %v498_v5, 2 }
 0x169   : > { %v493_v8 = vadd.f32 %v492_v6, %v491_v4 }
 0x16a   : > { %v500_v9 = vadd.f32 %v499_v7, %v498_v5 }
 0x16b   : > { %v494_v10 = vrot.slane %v493_v8, 1 }
 0x16c   : > { %v501_v11 = vrot.slane %v500_v9, 1 }
 0x16d   : > { %v495_v12 = vadd.f32 %v494_v10, %v493_v8 }
 0x16e   : > { %v502_v13 = vadd.f32 %v501_v11, %v500_v9 }
 0x16f   : > { %v503_v14 = vmul.f32 0.0625, %v495_v12 }
 0x170   : > { %v504_v15 = vmul.f32 0.0625, %v502_v13 }
 0x171   : > { %v506_v16 = vadd.f32 1e-05, %v503_v14 }
 0x172   : > { %v507_v17 = vadd.f32 1e-05, %v504_v15 }
 0x173   : > { %911 = vrsqrt.f32 %v506_v16 }
 0x174   : > { %913 = vrsqrt.f32 %v507_v17 }
 0x17d   : > { %v912_v23 = vpop.eup %911 }
 0x17e   : > { %v914_v25 = vpop.eup %913 }
 0x17f   : > { %v512_v26 = vcombine.low %v912_v23, %v914_v25 }
 0x181   : > { %v519_v27 = vrot.slane %v512_v26, %v518_v24 }
 0x183   : > { %v526_v29 = vrot.slane %v519_v27, %v518_v24 }
 0x185   : > { %v528_v32 = vmul.f32 %v526_v29, %v505_v28 }
 0x187   : > { %v534_v33 = vrot.slane %v528_v32, %v533_v30  ;;  %v538_v34 = vrot.slane %v528_v32, %v537_v31 }
 0x189   : > { %v541_v35 = vmul.f32 %v534_v33, %v479_v54  ;;  %v542_v40 = vmul.f32 %v538_v34, %v480_v55  ;;  %v569_v41 = vmul.f32 %v534_v33, %v1224_v36  ;;  %v570_v42 = vmul.f32 %v538_v34, %v1228_v38 }
 0x18a   : > { %v571_v43 = vmul.f32 %v534_v33, %v1226_v37  ;;  %v572_v44 = vmul.f32 %v538_v34, %v1230_v39 }
 0x18b   : > { %v545_v45 = vcombine.low %v541_v35, %v542_v40 }
 0x18d   : > { %v552_v46 = vrot.slane %v545_v45, %v518_v24 }
 0x18f   : > { %v559_v48 = vrot.slane %v552_v46, %v518_v24 }
 0x191   : > { %v561_v49 = vsub.f32 %v529_v47, %v559_v48 }
 0x193   : > { %v577_v50 = vrot.slane %v561_v49, %v533_v30  ;;  %v581_v51 = vrot.slane %v561_v49, %v537_v31 }
 0x195   : > { %v584_v52 = vadd.f32 %v577_v50, %v569_v41  ;;  %v585_v36 = vadd.f32 %v581_v51, %v570_v42  ;;  %v586_v53 = vadd.f32 %v577_v50, %v571_v43  ;;  %v587_v38 = vadd.f32 %v581_v51, %v572_v44 }
 0x197   : > { %915 = vtanh.f32 %v584_v52 }
 0x198   : > { %917 = vtanh.f32 %v585_v36 }
 0x199   : > { %919 = vtanh.f32 %v586_v53 }
 0x19a   : > { %921 = vtanh.f32 %v587_v38 }
 0x19f   : > { %602 = sbr.rel (!%p1286_p9) target bundleno = 430 (0x1ae), region = 52 }
 0x1a1   : > { %v916_v37 = vpop.eup %915 }
 0x1a2   : > { %v918_v39 = vpop.eup %917  ;;  %592 = vst [vmem:[%s272_s21] sm:$0xff] %v916_v37 }
 0x1a3   : > { %v920_v54 = vpop.eup %919  ;;  %593 = vst [vmem:[%s272_s21 + $0x8] sm:$0xff] %v918_v39 }
 0x1a4   : > { %v922_v55 = vpop.eup %921  ;;  %594 = vst [vmem:[%s272_s21 + $0x10] sm:$0xff] %v920_v54 }
 0x1a5   : > { %595 = vst [vmem:[%s272_s21 + $0x18] sm:$0xff] %v922_v55 }
 0x1a9   : > { %v618_v56 = vld [vmem:[%s272_s21] sm:$0xff] }
 0x1aa   : > { %v620_v57 = vld [vmem:[%s272_s21 + $0x8] sm:$0xff]  ;;  %619 = vst [vmem:[%s605_s13] sm:$0xff] %v618_v56 }
 0x1ab   : > { %v622_v58 = vld [vmem:[%s272_s21 + $0x10] sm:$0xff]  ;;  %621 = vst [vmem:[%s605_s13 + $0x8] sm:$0xff] %v620_v57 }
 0x1ac   : > { %v624_v59 = vld [vmem:[%s272_s21 + $0x18] sm:$0xff]  ;;  %623 = vst [vmem:[%s605_s13 + $0x20] sm:$0xff] %v622_v58 }
 0x1ad   : > { %625 = vst [vmem:[%s605_s13 + $0x28] sm:$0xff] %v624_v59 }
 0x1ae PF: > { %s17_s20 = sadd.s32 1, %s1003_s20   ;;  %s1287_s15 = smov %s987_s16 }
 0x1af   : > { %p14_p11 = scmp.ge.s32.totalorder %s17_s20, 4   ;;  %s1288_s16 = smov %s991_s17 }
 0x1b0   : > { %s1289_s17 = smov %s1083_s27  ;;  %s1290_s18 = smov %s999_s19 }
 0x1b1   : > { %s1291_s19 = smov %s1293_s22  ;;  %16 = sbr.rel (!%p14_p11) target bundleno = 4 (0x4), region = 117 }
 0x1b8   :  { %641 = vsyncpa [#allocation3], 1 }
 0x1b9   :  { %643 = vsyncpa [#allocation3 + $0x1], 1 }

</bundles_post_ra>
